<compile_context>
chip_gen: v7x
topology: tpu7x:2x2x1
jax: 0.10.0
libtpu: 0.0.40
codegen_flags: <defaults>
</compile_context>

<pallas_src>
import functools

import jax
import jax.numpy as jnp
from jax.experimental import pallas as pl
from jax.experimental.pallas import tpu as pltpu


_INV_SQRT2 = 0.7071067811865476
_SQRT_2_OVER_PI = 0.7978845608028654
_LANE = 128
_SUBLANE = 8


def _gelu(x, approximate):
    if approximate:
        # tanh approximation -> EUP (its own VLIW slot), frees the VALU.
        inner = _SQRT_2_OVER_PI * (x + 0.044715 * x * x * x)
        return 0.5 * x * (1.0 + jnp.tanh(inner))
    # torch.nn.GELU() default: 0.5 * x * (1 + erf(x / sqrt(2)))
    return 0.5 * x * (1.0 + jax.lax.erf(x * _INV_SQRT2))


def _fused_forward_kernel(*refs, n_hidden, eps, true_b, approximate, mxu_dtype):
    """refs = [x, (w, gamma, beta) * n_hidden, w_pred, b_pred, out]."""
    x_ref = refs[0]
    o_ref = refs[-1]

    h = x_ref[...]                       # f32 [B_pad, D0_pad]
    b_pad = h.shape[0]
    need_row_mask = b_pad != true_b
    if need_row_mask:
        row = jax.lax.broadcasted_iota(jnp.int32, (b_pad, 1), 0)
        row_mask = row < true_b
    inv_b = 1.0 / float(true_b)

    idx = 1
    for _ in range(n_hidden):
        w_ref, g_ref, b_ref = refs[idx], refs[idx + 1], refs[idx + 2]
        idx += 3
        # Linear (no bias) on the MXU, bf16 operands, f32 accumulation.
        z = jnp.dot(h.astype(mxu_dtype), w_ref[...].astype(mxu_dtype),
                    preferred_element_type=jnp.float32)
        # BatchNorm1d, training-mode batch stats.  Padded batch rows of z are
        # exactly zero (padded x rows are zero and h rows are re-masked below),
        # so plain sums divided by the TRUE batch size are exact.
        mean = jnp.sum(z, axis=0, keepdims=True) * inv_b
        mean_sq = jnp.sum(z * z, axis=0, keepdims=True) * inv_b
        var = jnp.maximum(mean_sq - mean * mean, 0.0)     # biased variance
        # Fold BN affine into one scale/shift computed on the [1, d_out] row.
        scale = g_ref[...] * jax.lax.rsqrt(var + eps)
        shift = b_ref[...] - mean * scale
        h = _gelu(z * scale + shift, approximate)
        if need_row_mask:
            h = jnp.where(row_mask, h, 0.0)               # keep pad rows zero

    wp_ref, bp_ref = refs[idx], refs[idx + 1]
    o_ref[...] = (
        jnp.dot(h.astype(mxu_dtype), wp_ref[...].astype(mxu_dtype),
                preferred_element_type=jnp.float32)
        + bp_ref[...]
    )


def _pad_to(a, axis, multiple, value=0.0):
    pad = (-a.shape[axis]) % multiple
    if pad == 0:
        return a
    widths = [(0, 0)] * a.ndim
    widths[axis] = (0, pad)
    return jnp.pad(a, widths, constant_values=value)


def _vmem_spec():
    return pl.BlockSpec(memory_space=pltpu.MemorySpace.VMEM)


def prepare_params(params, use_bf16_mxu=True):
    """One-time prep: pad feature dims to 128-lane multiples, pre-cast weights.

    Returns a dict consumed by net_forward; do this once, not per call.
    """
    w_dtype = jnp.bfloat16 if use_bf16_mxu else jnp.float32
    hidden = []
    for layer in params["hidden"]:
        w = _pad_to(_pad_to(layer["w"], 0, _LANE), 1, _LANE).astype(w_dtype)
        g = _pad_to(layer["gamma"], 1, _LANE, value=1.0).astype(jnp.float32)
        b = _pad_to(layer["beta"], 1, _LANE, value=0.0).astype(jnp.float32)
        hidden.append((w, g, b))
    wp = _pad_to(_pad_to(params["predict"]["w"], 0, _LANE), 1, _LANE).astype(w_dtype)
    bp = _pad_to(params["predict"]["b"], 1, _LANE).astype(jnp.float32)
    return {
        "hidden": hidden,
        "wp": wp,
        "bp": bp,
        "n_input": params["hidden"][0]["w"].shape[0] if params["hidden"]
        else params["predict"]["w"].shape[0],
        "n_output": params["predict"]["w"].shape[1],
        "mxu_dtype": w_dtype,
    }


def net_forward(prepared, x, approximate_gelu=True):
    """Fused forward pass.  x: [B, n_input] float32 -> [B, n_output] float32."""
    # TODO(synk): dropout_ratio is stored but never used in the PyTorch forward
    # (self.dropouts stays empty), so no dropout is applied here.
    B = x.shape[0]
    n_output = prepared["n_output"]
    n_hidden = len(prepared["hidden"])
    eps = 1e-5
    mxu_dtype = prepared["mxu_dtype"]

    # Only the activations get padded per call: feature axis to 128 lanes,
    # batch axis to 8 sublanes (f32).  Pad rows are zeros and are handled
    # exactly inside the kernel (masked rows + division by the true B).
    xp = _pad_to(_pad_to(x.astype(jnp.float32), 1, _LANE), 0, _SUBLANE)
    B_pad = xp.shape[0]

    inputs = [xp]
    padded_dims = [xp.shape[1]]
    for (w, g, b) in prepared["hidden"]:
        inputs += [w, g, b]
        padded_dims.append(w.shape[1])
    inputs += [prepared["wp"], prepared["bp"]]
    padded_dims.append(prepared["wp"].shape[1])
    out_pad = prepared["wp"].shape[1]

    # ---- Cost estimate (advisory scheduling hint). --------------------------
    flops = 0
    transcendentals = 0
    for din, dout in zip(padded_dims[:-1], padded_dims[1:]):
        flops += 2 * B_pad * din * dout
    for dout in padded_dims[1:-1]:
        flops += 10 * B_pad * dout              # BN scale/shift + GELU sweep
        transcendentals += 2 * B_pad * dout     # rsqrt + tanh/erf
    bytes_accessed = (
        sum(int(a.size) * a.dtype.itemsize for a in inputs)
        + B_pad * out_pad * 4
    )
    cost = pl.CostEstimate(
        flops=flops, transcendentals=transcendentals, bytes_accessed=bytes_accessed
    )

    # ---- One fused pallas_call; everything resident in VMEM (tiny shapes). --
    out = pl.pallas_call(
        functools.partial(
            _fused_forward_kernel,
            n_hidden=n_hidden,
            eps=eps,
            true_b=B,
            approximate=approximate_gelu,
            mxu_dtype=mxu_dtype,
        ),
        out_shape=jax.ShapeDtypeStruct((B_pad, out_pad), jnp.float32),
        in_specs=[_vmem_spec()] * len(inputs),
        out_specs=_vmem_spec(),
        cost_estimate=cost,
    )(*inputs)

    # Slice the real rows/columns back out.
    return out[:B, :n_output]


def init_params(key, n_input, hidden_shape, n_output):
    """Deterministic parameter init mirroring the PyTorch __init__ shapes."""
    params = {"hidden": [], "predict": {}}
    nchannels = n_input
    for h in hidden_shape:
        key, kw = jax.random.split(key)
        # xavier_normal_: std = sqrt(2 / (fan_in + fan_out))
        std = (2.0 / (nchannels + h)) ** 0.5
        w = jax.random.normal(kw, (nchannels, h), jnp.float32) * std  # [in, out]
        gamma = jnp.ones((1, h), jnp.float32)   # BatchNorm1d weight
        beta = jnp.zeros((1, h), jnp.float32)   # BatchNorm1d bias
        params["hidden"].append({"w": w, "gamma": gamma, "beta": beta})
        nchannels = h
    key, kw, kb = jax.random.split(key, 3)
    std = (2.0 / (nchannels + n_output)) ** 0.5
    wp = jax.random.normal(kw, (nchannels, n_output), jnp.float32) * std
    bound = 1.0 / (nchannels ** 0.5)  # PyTorch default Linear bias init
    bp = jax.random.uniform(
        kb, (1, n_output), jnp.float32, minval=-bound, maxval=bound
    )
    params["predict"] = {"w": wp, "b": bp}
    return params


if __name__ == "__main__":
    n_input = 16
    hidden_shape = (32, 64)
    n_output = 4
    batch = 8

    key = jax.random.PRNGKey(0)
    key, kx = jax.random.split(key)
    x = jax.random.normal(kx, (batch, n_input), jnp.float32)

    params = init_params(key, n_input, hidden_shape, n_output)
    prepared = prepare_params(params, use_bf16_mxu=True)  # one-time prep

    out = net_forward(prepared, x)
    jax.block_until_ready(out)
    assert out.shape == (batch, n_output), out.shape
    assert bool(jnp.all(jnp.isfinite(out))), "non-finite output"
    print("KERNEL_OK")
</pallas_src>

<mosaic_0001>
module attributes {stable_mosaic.version = 11 : i64} {
  func.func @_fused_forward_kernel(%arg0: memref<8x128xf32, #tpu.memory_space<vmem>>, %arg1: memref<128x128xbf16, #tpu.memory_space<vmem>>, %arg2: memref<1x128xf32, #tpu.memory_space<vmem>>, %arg3: memref<1x128xf32, #tpu.memory_space<vmem>>, %arg4: memref<128x128xbf16, #tpu.memory_space<vmem>>, %arg5: memref<1x128xf32, #tpu.memory_space<vmem>>, %arg6: memref<1x128xf32, #tpu.memory_space<vmem>>, %arg7: memref<128x128xbf16, #tpu.memory_space<vmem>>, %arg8: memref<1x128xf32, #tpu.memory_space<vmem>>, %arg9: memref<8x128xf32, #tpu.memory_space<vmem>>) attributes {dimension_semantics = [], scalar_prefetch = 0 : i64, scratch_operands = 0 : i64, tpu.core_type = #tpu.core_type<tc>} {
    %c0 = arith.constant 0 : index
    %c0_0 = arith.constant 0 : index
    %0 = vector.load %arg0[%c0, %c0_0] : memref<8x128xf32, #tpu.memory_space<vmem>>, vector<8x128xf32>
    %1 = arith.truncf %0 : vector<8x128xf32> to vector<8x128xbf16>
    %c0_1 = arith.constant 0 : index
    %c0_2 = arith.constant 0 : index
    %2 = vector.load %arg1[%c0_1, %c0_2] : memref<128x128xbf16, #tpu.memory_space<vmem>>, vector<128x128xbf16>
    %cst = arith.constant dense<0.000000e+00> : vector<8x128xf32>
    %3 = tpu.matmul %1, %2, %cst {dimension_numbers = #tpu.dot_dimension_numbers<[1], [0], [0], [1], [0, 0, 1, 1], [], []>} : vector<8x128xbf16>, vector<128x128xbf16>, vector<8x128xf32> -> vector<8x128xf32>
    %cst_3 = arith.constant dense<0.000000e+00> : vector<128xf32>
    %4 = vector.multi_reduction <add>, %3, %cst_3 [0] : vector<8x128xf32> to vector<128xf32>
    %5 = vector.shape_cast %4 : vector<128xf32> to vector<1x128xf32>
    %cst_4 = arith.constant 1.250000e-01 : f32
    %6 = vector.broadcast %cst_4 : f32 to vector<1x128xf32>
    %7 = arith.mulf %5, %6 : vector<1x128xf32>
    %8 = arith.mulf %3, %3 : vector<8x128xf32>
    %cst_5 = arith.constant dense<0.000000e+00> : vector<128xf32>
    %9 = vector.multi_reduction <add>, %8, %cst_5 [0] : vector<8x128xf32> to vector<128xf32>
    %10 = vector.shape_cast %9 : vector<128xf32> to vector<1x128xf32>
    %cst_6 = arith.constant 1.250000e-01 : f32
    %11 = vector.broadcast %cst_6 : f32 to vector<1x128xf32>
    %12 = arith.mulf %10, %11 : vector<1x128xf32>
    %13 = arith.mulf %7, %7 : vector<1x128xf32>
    %14 = arith.subf %12, %13 : vector<1x128xf32>
    %cst_7 = arith.constant 0.000000e+00 : f32
    %15 = vector.broadcast %cst_7 : f32 to vector<1x128xf32>
    %16 = arith.maximumf %14, %15 : vector<1x128xf32>
    %c0_8 = arith.constant 0 : index
    %c0_9 = arith.constant 0 : index
    %17 = vector.load %arg2[%c0_8, %c0_9] : memref<1x128xf32, #tpu.memory_space<vmem>>, vector<1x128xf32>
    %cst_10 = arith.constant 9.99999974E-6 : f32
    %18 = vector.broadcast %cst_10 : f32 to vector<1x128xf32>
    %19 = arith.addf %16, %18 : vector<1x128xf32>
    %20 = math.rsqrt %19 : vector<1x128xf32>
    %21 = arith.mulf %17, %20 : vector<1x128xf32>
    %c0_11 = arith.constant 0 : index
    %c0_12 = arith.constant 0 : index
    %22 = vector.load %arg3[%c0_11, %c0_12] : memref<1x128xf32, #tpu.memory_space<vmem>>, vector<1x128xf32>
    %23 = arith.mulf %7, %21 : vector<1x128xf32>
    %24 = arith.subf %22, %23 : vector<1x128xf32>
    %25 = vector.broadcast %21 : vector<1x128xf32> to vector<8x128xf32>
    %26 = arith.mulf %3, %25 : vector<8x128xf32>
    %27 = vector.broadcast %24 : vector<1x128xf32> to vector<8x128xf32>
    %28 = arith.addf %26, %27 : vector<8x128xf32>
    %cst_13 = arith.constant 4.471500e-02 : f32
    %29 = vector.broadcast %cst_13 : f32 to vector<8x128xf32>
    %30 = arith.mulf %29, %28 : vector<8x128xf32>
    %31 = arith.mulf %30, %28 : vector<8x128xf32>
    %32 = arith.mulf %31, %28 : vector<8x128xf32>
    %33 = arith.addf %28, %32 : vector<8x128xf32>
    %cst_14 = arith.constant 0.797884583 : f32
    %34 = vector.broadcast %cst_14 : f32 to vector<8x128xf32>
    %35 = arith.mulf %34, %33 : vector<8x128xf32>
    %cst_15 = arith.constant 5.000000e-01 : f32
    %36 = vector.broadcast %cst_15 : f32 to vector<8x128xf32>
    %37 = arith.mulf %36, %28 : vector<8x128xf32>
    %38 = math.tanh %35 : vector<8x128xf32>
    %cst_16 = arith.constant 1.000000e+00 : f32
    %39 = vector.broadcast %cst_16 : f32 to vector<8x128xf32>
    %40 = arith.addf %39, %38 : vector<8x128xf32>
    %41 = arith.mulf %37, %40 : vector<8x128xf32>
    %42 = arith.truncf %41 : vector<8x128xf32> to vector<8x128xbf16>
    %c0_17 = arith.constant 0 : index
    %c0_18 = arith.constant 0 : index
    %43 = vector.load %arg4[%c0_17, %c0_18] : memref<128x128xbf16, #tpu.memory_space<vmem>>, vector<128x128xbf16>
    %cst_19 = arith.constant dense<0.000000e+00> : vector<8x128xf32>
    %44 = tpu.matmul %42, %43, %cst_19 {dimension_numbers = #tpu.dot_dimension_numbers<[1], [0], [0], [1], [0, 0, 1, 1], [], []>} : vector<8x128xbf16>, vector<128x128xbf16>, vector<8x128xf32> -> vector<8x128xf32>
    %cst_20 = arith.constant dense<0.000000e+00> : vector<128xf32>
    %45 = vector.multi_reduction <add>, %44, %cst_20 [0] : vector<8x128xf32> to vector<128xf32>
    %46 = vector.shape_cast %45 : vector<128xf32> to vector<1x128xf32>
    %cst_21 = arith.constant 1.250000e-01 : f32
    %47 = vector.broadcast %cst_21 : f32 to vector<1x128xf32>
    %48 = arith.mulf %46, %47 : vector<1x128xf32>
    %49 = arith.mulf %44, %44 : vector<8x128xf32>
    %cst_22 = arith.constant dense<0.000000e+00> : vector<128xf32>
    %50 = vector.multi_reduction <add>, %49, %cst_22 [0] : vector<8x128xf32> to vector<128xf32>
    %51 = vector.shape_cast %50 : vector<128xf32> to vector<1x128xf32>
    %cst_23 = arith.constant 1.250000e-01 : f32
    %52 = vector.broadcast %cst_23 : f32 to vector<1x128xf32>
    %53 = arith.mulf %51, %52 : vector<1x128xf32>
    %54 = arith.mulf %48, %48 : vector<1x128xf32>
    %55 = arith.subf %53, %54 : vector<1x128xf32>
    %cst_24 = arith.constant 0.000000e+00 : f32
    %56 = vector.broadcast %cst_24 : f32 to vector<1x128xf32>
    %57 = arith.maximumf %55, %56 : vector<1x128xf32>
    %c0_25 = arith.constant 0 : index
    %c0_26 = arith.constant 0 : index
    %58 = vector.load %arg5[%c0_25, %c0_26] : memref<1x128xf32, #tpu.memory_space<vmem>>, vector<1x128xf32>
    %cst_27 = arith.constant 9.99999974E-6 : f32
    %59 = vector.broadcast %cst_27 : f32 to vector<1x128xf32>
    %60 = arith.addf %57, %59 : vector<1x128xf32>
    %61 = math.rsqrt %60 : vector<1x128xf32>
    %62 = arith.mulf %58, %61 : vector<1x128xf32>
    %c0_28 = arith.constant 0 : index
    %c0_29 = arith.constant 0 : index
    %63 = vector.load %arg6[%c0_28, %c0_29] : memref<1x128xf32, #tpu.memory_space<vmem>>, vector<1x128xf32>
    %64 = arith.mulf %48, %62 : vector<1x128xf32>
    %65 = arith.subf %63, %64 : vector<1x128xf32>
    %66 = vector.broadcast %62 : vector<1x128xf32> to vector<8x128xf32>
    %67 = arith.mulf %44, %66 : vector<8x128xf32>
    %68 = vector.broadcast %65 : vector<1x128xf32> to vector<8x128xf32>
    %69 = arith.addf %67, %68 : vector<8x128xf32>
    %cst_30 = arith.constant 4.471500e-02 : f32
    %70 = vector.broadcast %cst_30 : f32 to vector<8x128xf32>
    %71 = arith.mulf %70, %69 : vector<8x128xf32>
    %72 = arith.mulf %71, %69 : vector<8x128xf32>
    %73 = arith.mulf %72, %69 : vector<8x128xf32>
    %74 = arith.addf %69, %73 : vector<8x128xf32>
    %cst_31 = arith.constant 0.797884583 : f32
    %75 = vector.broadcast %cst_31 : f32 to vector<8x128xf32>
    %76 = arith.mulf %75, %74 : vector<8x128xf32>
    %cst_32 = arith.constant 5.000000e-01 : f32
    %77 = vector.broadcast %cst_32 : f32 to vector<8x128xf32>
    %78 = arith.mulf %77, %69 : vector<8x128xf32>
    %79 = math.tanh %76 : vector<8x128xf32>
    %cst_33 = arith.constant 1.000000e+00 : f32
    %80 = vector.broadcast %cst_33 : f32 to vector<8x128xf32>
    %81 = arith.addf %80, %79 : vector<8x128xf32>
    %82 = arith.mulf %78, %81 : vector<8x128xf32>
    %83 = arith.truncf %82 : vector<8x128xf32> to vector<8x128xbf16>
    %c0_34 = arith.constant 0 : index
    %c0_35 = arith.constant 0 : index
    %84 = vector.load %arg7[%c0_34, %c0_35] : memref<128x128xbf16, #tpu.memory_space<vmem>>, vector<128x128xbf16>
    %cst_36 = arith.constant dense<0.000000e+00> : vector<8x128xf32>
    %85 = tpu.matmul %83, %84, %cst_36 {dimension_numbers = #tpu.dot_dimension_numbers<[1], [0], [0], [1], [0, 0, 1, 1], [], []>} : vector<8x128xbf16>, vector<128x128xbf16>, vector<8x128xf32> -> vector<8x128xf32>
    %c0_37 = arith.constant 0 : index
    %c0_38 = arith.constant 0 : index
    %86 = vector.load %arg8[%c0_37, %c0_38] : memref<1x128xf32, #tpu.memory_space<vmem>>, vector<1x128xf32>
    %87 = vector.broadcast %86 : vector<1x128xf32> to vector<8x128xf32>
    %88 = arith.addf %85, %87 : vector<8x128xf32>
    %c0_39 = arith.constant 0 : index
    %c0_40 = arith.constant 0 : index
    %89 = vector.load %arg9[%c0_39, %c0_40] : memref<8x128xf32, #tpu.memory_space<vmem>>, vector<8x128xf32>
    tpu.vector_store %arg9[%c0_39, %c0_40], %88 {strides = array<i32>} : memref<8x128xf32, #tpu.memory_space<vmem>>, vector<8x128xf32>,
    return
  }
}

</mosaic_0001>

<bundles_post_ra>
// kernel: tpu_custom_call.1
= control target key start
LH: loop header
LB: loop body
LE: loop exit
PB: predicated region body
PF: predicated region fallthrough
CT: control target
= control target key end

     0   :  { %14 = vsyncpa [#allocation3], 0  ;;  %s974_s0 = inlined_call_operand.hbm [shape: f32[8,128], index: 0, kind: input, shape index: {}]   ;;  %s975_s1 = inlined_call_operand.hbm [shape: bf16[128,128], index: 1, kind: input, shape index: {}]   ;;  %s976_s2 = inlined_call_operand.vmem [shape: f32[1,128], index: 2, kind: input, shape index: {}]   ;;  %s977_s3 = inlined_call_operand.vmem [shape: f32[1,128], index: 3, kind: input, shape index: {}]   ;;  %s978_s4 = inlined_call_operand.hbm [shape: bf16[128,128], index: 4, kind: input, shape index: {}]   ;;  %s979_s5 = inlined_call_operand.vmem [shape: f32[1,128], index: 5, kind: input, shape index: {}]   ;;  %s980_s6 = inlined_call_operand.vmem [shape: f32[1,128], index: 6, kind: input, shape index: {}]   ;;  %s981_s7 = inlined_call_operand.hbm [shape: bf16[128,128], index: 7, kind: input, shape index: {}]   ;;  %s982_s8 = inlined_call_operand.vmem [shape: f32[1,128], index: 8, kind: input, shape index: {}]   ;;  %s983_s9 = inlined_call_operand.hbm [shape: f32[8,128], index: 9, kind: output, shape index: {}]  }
   0x1   :  { %15 = vsyncpa [#allocation6], 0 }
   0x2   :  { %16 = vsyncpa [#allocation9], 0 }
   0x3   :  { %17 = vsyncpa [#allocation4], 0  ;;  %s795_s30 = smov [#allocation5]   ;;  %s677_s13 = scalar_lea.hbm %s975_s1, 1024 }
   0x4   :  { %s33_s10 = sshll.u32 %s795_s30, 4  ;;  %p678_p0 = scmp.ne.s32.totalorder %s975_s1, %s677_s13  ;;  %s34_s10 = int_to_ptr.vmem [resolvable:$true] %s33_s10 }
   0x5   :  { %p681_p1 = scmp.lt.u32.totalorder %s677_s13, %s975_s1 }
   0x7   :  { %p683_p2 = pnand %p681_p1, %p678_p0 }
   0x9   :  { %686 = shalt.err (!%p683_p2)
}
   0xa   :  { %s687_s18 = scalar_lea.vmem %s34_s10, 1024  ;;  %p692_p4 = scmp.lt.s32.totalorder %s34_s10, %s34_s10 }
   0xb   :  { %p688_p3 = scmp.ne.s32.totalorder %s34_s10, %s687_s18  ;;  %p693_p5 = scmp.lt.s32.totalorder %s687_s18, %s687_s18 }
   0xd   :  { %p694_p6 = por %p693_p5, %p692_p4 }
   0xf   :  { %p695_p7 = pnand %p694_p6, %p688_p3 }
  0x11   :  { %698 = shalt.err (!%p695_p7)
}
  0x12   :  { %s796_s19 = smov 64   ;;  %s797_s20 = smov 4  }
  0x13   :  { %39 = dma.hbm_to_vmem [thread:$0]  %s975_s1, 1024, %s34_s10, [#allocation6], %s796_s19, %s796_s19, %s797_s20  }
  0x14   :  { %s798_s23 = smov [#allocation2]   ;;  %s799_s25 = smov [#allocation7]  }
  0x15   :  { %s24_s24 = sshll.u32 %s798_s23, 4  ;;  %s49_s26 = sshll.u32 %s799_s25, 4  ;;  %s25_s24 = int_to_ptr.vmem [resolvable:$true] %s24_s24  ;;  %s50_s26 = int_to_ptr.vmem [resolvable:$true] %s49_s26 }
  0x16   :  { %s699_s29 = scalar_lea.hbm %s974_s0, 128 }
  0x17   :  { %p700_p8 = scmp.ne.s32.totalorder %s974_s0, %s699_s29  ;;  %p703_p9 = scmp.lt.u32.totalorder %s699_s29, %s974_s0 }
  0x19   :  { %p705_p10 = pnand %p703_p9, %p700_p8 }
  0x1b   :  { %708 = shalt.err (!%p705_p10)
}
  0x1c   :  { %s709_s1 = scalar_lea.vmem %s25_s24, 128  ;;  %p714_p12 = scmp.lt.s32.totalorder %s25_s24, %s25_s24 }
  0x1d   :  { %p710_p11 = scmp.ne.s32.totalorder %s25_s24, %s709_s1  ;;  %p715_p13 = scmp.lt.s32.totalorder %s709_s1, %s709_s1 }
  0x1f   :  { %p716_p0 = por %p715_p13, %p714_p12 }
  0x21   :  { %p717_p1 = pnand %p716_p0, %p710_p11 }
  0x23   :  { %720 = shalt.err (!%p717_p1)
}
  0x24   :  { %27 = dma.hbm_to_vmem [thread:$0]  %s974_s0, 128, %s25_s24, [#allocation3]  }
  0x25   :  { %s721_s17 = scalar_lea.hbm %s978_s4, 1024 }
  0x26   :  { %p722_p2 = scmp.ne.s32.totalorder %s978_s4, %s721_s17  ;;  %p725_p3 = scmp.lt.u32.totalorder %s721_s17, %s978_s4 }
  0x28   :  { %p727_p4 = pnand %p725_p3, %p722_p2 }
  0x2a   :  { %730 = shalt.err (!%p727_p4)
}
  0x2b   :  { %s731_s25 = scalar_lea.vmem %s50_s26, 1024  ;;  %p736_p6 = scmp.lt.s32.totalorder %s50_s26, %s50_s26 }
  0x2c   :  { %p732_p5 = scmp.ne.s32.totalorder %s50_s26, %s731_s25  ;;  %p737_p7 = scmp.lt.s32.totalorder %s731_s25, %s731_s25 }
  0x2e   :  { %p738_p8 = por %p737_p7, %p736_p6 }
  0x30   :  { %p739_p9 = pnand %p738_p8, %p732_p5 }
  0x32   :  { %742 = shalt.err (!%p739_p9)
}
  0x33   :  { %55 = dma.hbm_to_vmem [thread:$0]  %s978_s4, 1024, %s50_s26, [#allocation6], %s796_s19, %s796_s19, %s797_s20  }
  0x34   :  { %s800_s27 = smov [#allocation8]   ;;  %s743_s11 = scalar_lea.hbm %s981_s7, 1024 }
  0x35   :  { %s65_s28 = sshll.u32 %s800_s27, 4  ;;  %p744_p10 = scmp.ne.s32.totalorder %s981_s7, %s743_s11  ;;  %s66_s28 = int_to_ptr.vmem [resolvable:$true] %s65_s28 }
  0x36   :  { %p747_p11 = scmp.lt.u32.totalorder %s743_s11, %s981_s7 }
  0x38   :  { %p749_p12 = pnand %p747_p11, %p744_p10 }
  0x3a   :  { %752 = shalt.err (!%p749_p12)
}
  0x3b   :  { %s753_s14 = scalar_lea.vmem %s66_s28, 1024  ;;  %p758_p0 = scmp.lt.s32.totalorder %s66_s28, %s66_s28 }
  0x3c   :  { %p754_p13 = scmp.ne.s32.totalorder %s66_s28, %s753_s14  ;;  %p759_p1 = scmp.lt.s32.totalorder %s753_s14, %s753_s14 }
  0x3e   :  { %p760_p2 = por %p759_p1, %p758_p0 }
  0x40   :  { %p761_p3 = pnand %p760_p2, %p754_p13 }
  0x42   :  { %764 = shalt.err (!%p761_p3)
}
  0x43   :  { %71 = dma.hbm_to_vmem [thread:$0]  %s981_s7, 1024, %s66_s28, [#allocation9], %s796_s19, %s796_s19, %s797_s20  }
  0x44   :  { %787 = dma.done.wait [#allocation3], 128  }
  0x45   :  { %788 = vsyncadd [#allocation3], 4294967168 }
  0x46   :  { %789 = dma.done.wait [#allocation6], 2048  }
  0x47   :  { %790 = vsyncadd [#allocation6], 4294965248 }
  0x48   :  { %791 = dma.done.wait [#allocation9], 1024  }
  0x49   :  { %792 = vsyncadd [#allocation9], 4294966272  ;;  %v801_v0 = vmov 0.0   ;;  %vm802_vm0 = vmmov 0   ;;  %v645_v1 = vld [vmem:[#allocation5] sm:$0xff]   ;;  %v646_v2 = vld [vmem:[#allocation5 + $0x8] sm:$0xff]   ;;  %v219_v42 = vlaneseq }
  0x4a   :  { %576 = vmatprep.subr.bf16.mxu0 %v801_v0  ;;  %592 = vmatprep.mubr.msk.bf16.mxu0 %vm802_vm0, %v801_v0  ;;  %v647_v3 = vld [vmem:[#allocation5 + $0x10] sm:$0xff]   ;;  %v648_v4 = vld [vmem:[#allocation5 + $0x18] sm:$0xff]   ;;  %v649_v5 = vld [vmem:[#allocation5 + $0x20] sm:$0xff]   ;;  %s803_s18 = smov [#allocation10]  }
  0x4b   :  { %596 = vmatprep.subr.bf16.mxu1 %v801_v0  ;;  %612 = vmatprep.mubr.msk.bf16.mxu1 %vm802_vm0, %v801_v0  ;;  %v650_v6 = vld [vmem:[#allocation5 + $0x28] sm:$0xff]   ;;  %v651_v7 = vld [vmem:[#allocation5 + $0x30] sm:$0xff]   ;;  %v652_v8 = vld [vmem:[#allocation5 + $0x38] sm:$0xff]   ;;  %v220_v43 = vshrl.u32 %v219_v42, 7  ;;  %s513_s21 = sshll.u32 %s803_s18, 4  ;;  %s514_s21 = int_to_ptr.vmem [resolvable:$true] %s513_s21 }
  0x4c   :  { %577 = vmatpush3.bf16.msra.mxu0 %v645_v1  ;;  %v87_v9 = vld [vmem:[#allocation2] sm:$0xff]  ;;  %v653_v11 = vld [vmem:[#allocation7] sm:$0xff]   ;;  %v654_v12 = vld [vmem:[#allocation7 + $0x8] sm:$0xff]   ;;  %s765_s22 = scalar_lea.vmem %s514_s21, 128  ;;  %p770_p5 = scmp.lt.s32.totalorder %s514_s21, %s514_s21 }
  0x4d   :  { %578 = vmatprep.subr.bf16.mxu0 %v801_v0  ;;  %v88_v10 = vpack.c.bf16 %v87_v9, %v87_v9  ;;  %597 = vmatpush3.bf16.msra.mxu1 %v653_v11  ;;  %v655_v13 = vld [vmem:[#allocation7 + $0x10] sm:$0xff]   ;;  %v656_v14 = vld [vmem:[#allocation7 + $0x18] sm:$0xff]   ;;  %v657_v15 = vld [vmem:[#allocation7 + $0x20] sm:$0xff]   ;;  %v937_v45 = vsub.s32 0, %v220_v43  ;;  %p766_p4 = scmp.ne.s32.totalorder %s514_s21, %s765_s22  ;;  %p771_p6 = scmp.lt.s32.totalorder %s765_s22, %s765_s22 }
  0x4e   :  { %598 = vmatprep.subr.bf16.mxu1 %v801_v0  ;;  %v658_v16 = vld [vmem:[#allocation7 + $0x28] sm:$0xff]   ;;  %v659_v17 = vld [vmem:[#allocation7 + $0x30] sm:$0xff]   ;;  %v660_v18 = vld [vmem:[#allocation7 + $0x38] sm:$0xff]  }
  0x4f   :  { %v211_v44 = vld [vmem:[%s976_s2] sm:$0x1]  ;;  %p772_p7 = por %p771_p6, %p770_p5 }
  0x50   :  { %579 = vmatpush3.bf16.msra.mxu0 %v646_v2  ;;  %v215_v48 = vld [vmem:[%s977_s3] sm:$0x1]  ;;  %v661_v2 = vld [vmem:[#allocation8] sm:$0xff]  }
  0x51   :  { %580 = vmatprep.subr.bf16.mxu0 %v801_v0  ;;  %599 = vmatpush3.bf16.msra.mxu1 %v654_v12  ;;  %v668_v9 = vld [vmem:[#allocation8 + $0x38] sm:$0xff]   ;;  %p773_p8 = pnand %p772_p7, %p766_p4 }
  0x52   :  { %600 = vmatprep.subr.bf16.mxu1 %v801_v0 }
  0x54   :  { %581 = vmatpush3.bf16.msra.mxu0 %v647_v3  ;;  %v662_v3 = vld [vmem:[#allocation8 + $0x8] sm:$0xff]  }
  0x55   :  { %582 = vmatprep.subr.bf16.mxu0 %v801_v0  ;;  %601 = vmatpush3.bf16.msra.mxu1 %v655_v13 }
  0x56   :  { %602 = vmatprep.subr.bf16.mxu1 %v801_v0 }
  0x58   :  { %583 = vmatpush3.bf16.msra.mxu0 %v648_v4  ;;  %v663_v4 = vld [vmem:[#allocation8 + $0x10] sm:$0xff]  }
  0x59   :  { %584 = vmatprep.subr.bf16.mxu0 %v801_v0  ;;  %603 = vmatpush3.bf16.msra.mxu1 %v656_v14 }
  0x5a   :  { %604 = vmatprep.subr.bf16.mxu1 %v801_v0 }
  0x5c   :  { %585 = vmatpush3.bf16.msra.mxu0 %v649_v5  ;;  %v664_v5 = vld [vmem:[#allocation8 + $0x18] sm:$0xff]  }
  0x5d   :  { %586 = vmatprep.subr.bf16.mxu0 %v801_v0  ;;  %605 = vmatpush3.bf16.msra.mxu1 %v657_v15 }
  0x5e   :  { %606 = vmatprep.subr.bf16.mxu1 %v801_v0 }
  0x60   :  { %587 = vmatpush3.bf16.msra.mxu0 %v650_v6  ;;  %v665_v6 = vld [vmem:[#allocation8 + $0x20] sm:$0xff]  }
  0x61   :  { %588 = vmatprep.subr.bf16.mxu0 %v801_v0  ;;  %607 = vmatpush3.bf16.msra.mxu1 %v658_v16 }
  0x62   :  { %608 = vmatprep.subr.bf16.mxu1 %v801_v0 }
  0x64   :  { %589 = vmatpush3.bf16.msra.mxu0 %v651_v7  ;;  %v666_v7 = vld [vmem:[#allocation8 + $0x28] sm:$0xff]  }
  0x65   :  { %590 = vmatprep.subr.bf16.mxu0 %v801_v0  ;;  %609 = vmatpush3.bf16.msra.mxu1 %v659_v17 }
  0x66   :  { %610 = vmatprep.subr.bf16.mxu1 %v801_v0 }
  0x68   :  { %591 = vmatpush3.bf16.msra.mxu0 %v652_v8  ;;  %v667_v8 = vld [vmem:[#allocation8 + $0x30] sm:$0xff]  }
  0x69   :  { %616 = vmatprep.subr.bf16.mxu0 %v801_v0  ;;  %611 = vmatpush3.bf16.msra.mxu1 %v660_v18 }
  0x6b   :  { %593 = vmatmul.mubr.bf16.vlgmr.msra.gmra.mrb[0].mxu0 %v88_v10 }
  0x6c   :  { %632 = vmatprep.mubr.msk.bf16.mxu0 %vm802_vm0, %v801_v0  ;;  %617 = vmatpush3.bf16.msra.mxu0 %v661_v2 }
  0x6d   :  { %618 = vmatprep.subr.bf16.mxu0 %v801_v0 }
  0x70   :  { %619 = vmatpush3.bf16.msra.mxu0 %v662_v3 }
  0x71   :  { %620 = vmatprep.subr.bf16.mxu0 %v801_v0 }
  0x74   :  { %621 = vmatpush3.bf16.msra.mxu0 %v663_v4 }
  0x75   :  { %622 = vmatprep.subr.bf16.mxu0 %v801_v0 }
  0x78   :  { %623 = vmatpush3.bf16.msra.mxu0 %v664_v5 }
  0x79   :  { %624 = vmatprep.subr.bf16.mxu0 %v801_v0 }
  0x7c   :  { %625 = vmatpush3.bf16.msra.mxu0 %v665_v6 }
  0x7d   :  { %626 = vmatprep.subr.bf16.mxu0 %v801_v0 }
  0x80   :  { %627 = vmatpush3.bf16.msra.mxu0 %v666_v7 }
  0x81   :  { %628 = vmatprep.subr.bf16.mxu0 %v801_v0 }
  0x84   :  { %629 = vmatpush3.bf16.msra.mxu0 %v667_v8 }
  0x85   :  { %630 = vmatprep.subr.bf16.mxu0 %v801_v0 }
  0x88   :  { %631 = vmatpush3.bf16.msra.mxu0 %v668_v9 }
 0x13e   :  { %v187_v19 = vpop.f32.mrb[0].mxu0 }
 0x13f   :  { %v193_v20 = vrot.slane %v187_v19, 4  ;;  %v200_v21 = vmul.f32 %v187_v19, %v187_v19  ;;  %v594_v22 = vpop.f32.mrb[1].mxu0 }
 0x140   :  { %v190_v23 = vpop.f32.mrb[2].mxu0 }
 0x141   :  { %v194_v24 = vadd.f32 %v193_v20, %v187_v19  ;;  %v201_v25 = vrot.slane %v200_v21, 4  ;;  %v595_v26 = vpop.f32.mrb[3].mxu0 }
 0x143   :  { %v195_v27 = vrot.slane %v194_v24, 2  ;;  %v202_v28 = vadd.f32 %v201_v25, %v200_v21 }
 0x145   :  { %v196_v29 = vadd.f32 %v195_v27, %v194_v24  ;;  %v203_v30 = vrot.slane %v202_v28, 2 }
 0x147   :  { %v197_v31 = vrot.slane %v196_v29, 1  ;;  %v204_v32 = vadd.f32 %v203_v30, %v202_v28 }
 0x149   :  { %v198_v33 = vadd.f32 %v197_v31, %v196_v29  ;;  %v205_v34 = vrot.slane %v204_v32, 1 }
 0x14b   :  { %v199_v35 = vmul.f32 0.125, %v198_v33  ;;  %v206_v36 = vadd.f32 %v205_v34, %v204_v32  ;;  %v364_v32 = vld [vmem:[%s979_s5] sm:$0x1] }
 0x14d   :  { %v207_v37 = vmul.f32 0.125, %v206_v36  ;;  %v208_v38 = vmul.f32 %v199_v35, %v199_v35 }
 0x14f   :  { %v209_v39 = vsub.f32 %v207_v37, %v208_v38 }
 0x151   :  { %v210_v40 = vmax.f32 %v209_v39, 0.0 }
 0x153   :  { %v212_v41 = vadd.f32 1e-05, %v210_v40 }
 0x155   :  { %669 = vrsqrt.f32 %v212_v41 }
 0x15f   :  { %v670_v46 = vpop.eup %669 }
 0x160   :  { %v214_v47 = vmul.f32 %v670_v46, %v211_v44 }
 0x162   :  { %v216_v49 = vmul.f32 %v214_v47, %v199_v35  ;;  %v222_v50 = vrot.slane %v214_v47, %v937_v45  ;;  %v368_v35 = vld [vmem:[%s980_s6] sm:$0x1] }
 0x164   :  { %v217_v51 = vsub.f32 %v215_v48, %v216_v49  ;;  %v224_v52 = vmul.f32 %v222_v50, %v187_v19 }
 0x166   :  { %v229_v53 = vrot.slane %v217_v51, %v937_v45 }
 0x168   :  { %v231_v54 = vadd.f32 %v229_v53, %v224_v52  ;;  %v540_v53 = vld [vmem:[%s982_s8] ss:$0 sm:$0xff] }
 0x16a   :  { %v232_v55 = vmul.f32 0.044715, %v231_v54  ;;  %v237_v61 = vmul.f32 0.5, %v231_v54 }
 0x16c   :  { %v233_v56 = vmul.f32 %v232_v55, %v231_v54 }
 0x16e   :  { %v234_v57 = vmul.f32 %v233_v56, %v231_v54 }
 0x170   :  { %v235_v58 = vadd.f32 %v234_v57, %v231_v54 }
 0x172   :  { %v236_v59 = vmul.f32 0.7978846, %v235_v58 }
 0x174   :  { %671 = vtanh.f32 %v236_v59 }
 0x17e   :  { %v672_v60 = vpop.eup %671 }
 0x17f   :  { %v239_v62 = vadd.f32 1.0, %v672_v60 }
 0x181   :  { %v240_v63 = vmul.f32 %v239_v62, %v237_v61 }
 0x183   :  { %v241_v1 = vpack.c.bf16 %v240_v63, %v240_v63 }
 0x185   :  { %613 = vmatmul.mubr.bf16.vlgmr.msra.gmra.mrb[0].mxu1 %v241_v1 }
 0x258   :  { %v340_v10 = vpop.f32.mrb[0].mxu1 }
 0x259   :  { %v346_v11 = vrot.slane %v340_v10, 4  ;;  %v353_v12 = vmul.f32 %v340_v10, %v340_v10  ;;  %v614_v13 = vpop.f32.mrb[1].mxu1 }
 0x25a   :  { %v343_v14 = vpop.f32.mrb[2].mxu1 }
 0x25b   :  { %v347_v15 = vadd.f32 %v346_v11, %v340_v10  ;;  %v354_v16 = vrot.slane %v353_v12, 4  ;;  %v615_v17 = vpop.f32.mrb[3].mxu1 }
 0x25d   :  { %v348_v18 = vrot.slane %v347_v15, 2  ;;  %v355_v19 = vadd.f32 %v354_v16, %v353_v12 }
 0x25f   :  { %v349_v20 = vadd.f32 %v348_v18, %v347_v15  ;;  %v356_v21 = vrot.slane %v355_v19, 2 }
 0x261   :  { %v350_v22 = vrot.slane %v349_v20, 1  ;;  %v357_v23 = vadd.f32 %v356_v21, %v355_v19 }
 0x263   :  { %v351_v24 = vadd.f32 %v350_v22, %v349_v20  ;;  %v358_v25 = vrot.slane %v357_v23, 1 }
 0x265   :  { %v352_v26 = vmul.f32 0.125, %v351_v24  ;;  %v359_v27 = vadd.f32 %v358_v25, %v357_v23 }
 0x267   :  { %v360_v0 = vmul.f32 0.125, %v359_v27  ;;  %v361_v28 = vmul.f32 %v352_v26, %v352_v26 }
 0x269   :  { %v362_v29 = vsub.f32 %v360_v0, %v361_v28 }
 0x26b   :  { %v363_v30 = vmax.f32 %v362_v29, 0.0 }
 0x26d   :  { %v365_v31 = vadd.f32 1e-05, %v363_v30 }
 0x26f   :  { %673 = vrsqrt.f32 %v365_v31 }
 0x279   :  { %v674_v33 = vpop.eup %673 }
 0x27a   :  { %v367_v34 = vmul.f32 %v674_v33, %v364_v32 }
 0x27c   :  { %v369_v36 = vmul.f32 %v367_v34, %v352_v26  ;;  %v375_v37 = vrot.slane %v367_v34, %v937_v45 }
 0x27e   :  { %v370_v38 = vsub.f32 %v368_v35, %v369_v36  ;;  %v377_v39 = vmul.f32 %v375_v37, %v340_v10 }
 0x280   :  { %v382_v40 = vrot.slane %v370_v38, %v937_v45 }
 0x282   :  { %v384_v41 = vadd.f32 %v382_v40, %v377_v39 }
 0x284   :  { %v385_v42 = vmul.f32 0.044715, %v384_v41  ;;  %v390_v49 = vmul.f32 0.5, %v384_v41 }
 0x286   :  { %v386_v43 = vmul.f32 %v385_v42, %v384_v41 }
 0x288   :  { %v387_v44 = vmul.f32 %v386_v43, %v384_v41 }
 0x28a   :  { %v388_v46 = vadd.f32 %v387_v44, %v384_v41 }
 0x28c   :  { %v389_v47 = vmul.f32 0.7978846, %v388_v46 }
 0x28e   :  { %675 = vtanh.f32 %v389_v47 }
 0x298   :  { %v676_v48 = vpop.eup %675 }
 0x299   :  { %v392_v50 = vadd.f32 1.0, %v676_v48 }
 0x29b   :  { %v393_v51 = vmul.f32 %v392_v50, %v390_v49 }
 0x29d   :  { %v394_v52 = vpack.c.bf16 %v393_v51, %v393_v51 }
 0x29f   :  { %633 = vmatmul.mubr.bf16.vlgmr.msra.gmra.mrb[4].mxu0 %v394_v52 }
 0x372   :  { %v500_v45 = vpop.f32.mrb[4].mxu0 }
 0x373   :  { %v501_v54 = vadd.f32 %v540_v53, %v500_v45  ;;  %v634_v55 = vpop.f32.mrb[5].mxu0 }
 0x374   :  { %v503_v56 = vpop.f32.mrb[6].mxu0 }
 0x375   :  { %506 = vst [vmem:[#allocation10] sm:$0xff] %v501_v54  ;;  %v635_v57 = vpop.f32.mrb[7].mxu0 }
 0x376   :  { %776 = shalt.err (!%p773_p8)
}
 0x377   :  { %s777_s8 = scalar_lea.hbm %s983_s9, 128 }
 0x378   :  { %p778_p9 = scmp.ne.s32.totalorder %s983_s9, %s777_s8  ;;  %p781_p10 = scmp.lt.u32.totalorder %s777_s8, %s983_s9 }
 0x37a   :  { %p783_p11 = pnand %p781_p10, %p778_p9 }
 0x37c   :  { %786 = shalt.err (!%p783_p11)
}
 0x37d   :  { %516 = dma.vmem_to_hbm [thread:$0]  %s514_s21, 128, %s983_s9, [#allocation4]  }
 0x37e   :  { %793 = dma.done.wait [#allocation4], 128  }
 0x37f   :  { %794 = vsyncadd [#allocation4], 4294967168 }
 0x380   :  { %520 = vsyncpa [#allocation3], 1 }
 0x381   :  { %521 = vsyncpa [#allocation6], 1 }
 0x382   :  { %522 = vsyncpa [#allocation9], 1 }
 0x383   :  { %523 = vsyncpa [#allocation4], 1 }

</bundles_post_ra>
